<compile_context>
chip_gen: v7x
topology: tpu7x:2x2x1
jax: 0.10.0
libtpu: 0.0.40
codegen_flags: <defaults>
</compile_context>

<pallas_src>
import math

import jax
import jax.numpy as jnp
from jax.experimental import pallas as pl
from jax.experimental.pallas import tpu as pltpu


# ---------------- Param (synthetic, small, deterministic) -----------------
class Param:
    gate_feat_in_num = 16
    gate_feat_out_num = 32
    room_emb_size = 32


PACK = 8  # gate rows packed per lane-dense super-row (8 * 16 = 128 lanes)


def _round_up(v, m):
    return -(-v // m) * m


def _multi_core_tc():
    """True on chips with 2 TensorCores (v7x) where CORE_PARALLEL pays off."""
    try:
        kind = jax.devices()[0].device_kind.lower()
    except Exception:
        return False
    return ("7x" in kind) or ("v7" in kind)


# ------------------------------ Pallas kernel ------------------------------
def gate_embedding_kernel(x_ref, w1_ref, b1_ref, w2_ref, b2_ref, o_ref):
    # In-kernel f32 -> bf16 cast: free VPU filler, avoids a wrapper-side
    # padded bf16 copy of x in HBM.
    x = x_ref[...].astype(jnp.bfloat16)
    # Linear 1 (block-diagonal packed): MXU, f32 accumulate.
    h = jnp.dot(x, w1_ref[...], preferred_element_type=jnp.float32)
    # Bias + ReLU in f32 (b1 is (1, PACK*fout) -> row broadcast).
    h = jnp.maximum(h + b1_ref[...], 0.0)
    # Linear 2 (block-diagonal packed): MXU, f32 accumulate.
    out = jnp.dot(h.astype(jnp.bfloat16), w2_ref[...],
                  preferred_element_type=jnp.float32)
    # Lane-dense bf16 store: last dim PACK*emb = 256 (multiple of 128).
    o_ref[...] = (out + b2_ref[...]).astype(o_ref.dtype)


# --------------------- one-time parameter packing (hoisted) ----------------
def pack_gate_params(w1, b1, w2, b2):
    """Build block-diagonal bf16 weights + tiled f32 biases ONCE; reuse."""
    fout = w1.shape[1]
    emb = w2.shape[1]
    w1_bd = jnp.kron(jnp.eye(PACK, dtype=w1.dtype), w1).astype(jnp.bfloat16)
    w2_bd = jnp.kron(jnp.eye(PACK, dtype=w2.dtype), w2).astype(jnp.bfloat16)
    b1_p = jnp.tile(b1, PACK).reshape(1, PACK * fout).astype(jnp.float32)
    b2_p = jnp.tile(b2, PACK).reshape(1, PACK * emb).astype(jnp.float32)
    return w1_bd, b1_p, w2_bd, b2_p


def gate_embedding(x, packed_params, *, block_rows=2048,
                   out_dtype=jnp.bfloat16):
    """x: [N, gate_feat_in_num] f32; returns [N, room_emb_size] (bf16 default).

    block_rows = max packed super-rows per grid step (2048 packed rows ==
    16384 original gate rows; ~4.5 MiB double-buffered VMEM footprint).
    """
    w1_bd, b1_p, w2_bd, b2_p = packed_params
    n, fin = x.shape
    fout = w1_bd.shape[1] // PACK
    emb = w2_bd.shape[1] // PACK

    # --- tiling: even, 8-aligned split of the packed rows ------------------
    np_rows = pl.cdiv(n, PACK)                 # packed super-rows needed
    np8 = _round_up(np_rows, 8)                # sublane alignment

    multi_core = _multi_core_tc()
    use_core_parallel = multi_core and np8 >= 16
    steps = pl.cdiv(np8, block_rows)
    if use_core_parallel:
        steps = max(steps, 2)
        steps += steps % 2                     # even grid -> both cores busy
    tm = _round_up(pl.cdiv(np8, steps), 8)     # even split, 8-aligned
    np_pad = steps * tm
    n_pad = np_pad * PACK

    # --- pack rows: (N, fin) -> (N_pad/PACK, PACK*fin), stay f32 -----------
    x_p = x if n_pad == n else jnp.pad(x, ((0, n_pad - n), (0, 0)))
    x_packed = x_p.reshape(np_pad, PACK * fin)   # contiguous reshape (free)

    # --- advisory cost estimate (useful flops / real HBM traffic) ----------
    flops = 2 * n * (fin * fout + fout * emb)
    bytes_accessed = (np_pad * PACK * fin * 4          # x read (f32)
                      + np_pad * PACK * emb * 2        # out write (bf16)
                      + (w1_bd.size + w2_bd.size) * 2  # weights (bf16)
                      + (b1_p.size + b2_p.size) * 4)   # biases (f32)

    dim_sem = ((pltpu.CORE_PARALLEL,) if use_core_parallel
               else (pltpu.PARALLEL,))

    out_packed = pl.pallas_call(
        gate_embedding_kernel,
        out_shape=jax.ShapeDtypeStruct((np_pad, PACK * emb), jnp.bfloat16),
        grid=(steps,),
        in_specs=[
            # x stream: tiled over packed rows, lane-dense (last dim 128).
            pl.BlockSpec((tm, PACK * fin), lambda i: (i, 0)),
            # weights/biases: constant index_map -> VMEM-resident.
            pl.BlockSpec((PACK * fin, PACK * fout), lambda i: (0, 0)),
            pl.BlockSpec((1, PACK * fout), lambda i: (0, 0)),
            pl.BlockSpec((PACK * fout, PACK * emb), lambda i: (0, 0)),
            pl.BlockSpec((1, PACK * emb), lambda i: (0, 0)),
        ],
        out_specs=pl.BlockSpec((tm, PACK * emb), lambda i: (i, 0)),
        compiler_params=pltpu.CompilerParams(
            dimension_semantics=dim_sem,
            # footprint ~4.5 MiB; 32 MiB cap valid on v5e/v6e/v7x alike
            vmem_limit_bytes=32 * 1024 * 1024,
        ),
        cost_estimate=pl.CostEstimate(
            flops=int(flops),
            transcendentals=0,
            bytes_accessed=int(bytes_accessed)),
    )(x_packed, w1_bd, b1_p, w2_bd, b2_p)

    # Free contiguous un-pack: (N_pad/PACK, PACK*emb) -> (N_pad, emb), slice.
    out = out_packed.reshape(n_pad, emb)[:n]
    if out_dtype != jnp.bfloat16:
        out = out.astype(out_dtype)
    return out


# ----------------------- deterministic parameter init ----------------------
def init_params(key):
    """Mimic nn.Linear default init: U(-1/sqrt(fan_in), 1/sqrt(fan_in))."""
    k1, k2, k3, k4 = jax.random.split(key, 4)
    fin, fout, emb = (Param.gate_feat_in_num, Param.gate_feat_out_num,
                      Param.room_emb_size)

    bound1 = 1.0 / math.sqrt(fin)
    # store weights as [in, out] so the kernel does x @ W
    w1 = jax.random.uniform(k1, (fin, fout), jnp.float32, -bound1, bound1)
    b1 = jax.random.uniform(k2, (fout,), jnp.float32, -bound1, bound1)

    bound2 = 1.0 / math.sqrt(fout)
    w2 = jax.random.uniform(k3, (fout, emb), jnp.float32, -bound2, bound2)
    b2 = jax.random.uniform(k4, (emb,), jnp.float32, -bound2, bound2)
    return w1, b1, w2, b2


# ------------------------------- reference ---------------------------------
def gate_embedding_ref(x, w1, b1, w2, b2):
    # Same mixed-precision recipe as the kernel: bf16 inputs, f32 accumulate.
    h = jnp.dot(x.astype(jnp.bfloat16), w1.astype(jnp.bfloat16),
                preferred_element_type=jnp.float32) + b1
    h = jnp.maximum(h, 0.0)
    return jnp.dot(h.astype(jnp.bfloat16), w2.astype(jnp.bfloat16),
                   preferred_element_type=jnp.float32) + b2


if __name__ == "__main__":
    key = jax.random.PRNGKey(0)
    k_x1, k_x2, k_p = jax.random.split(key, 3)
    w1, b1, w2, b2 = init_params(k_p)

    # Hoisted out of the per-call path: packed weights built once, reused.
    packed = pack_gate_params(w1, b1, w2, b2)

    # Tiny batch (matches original module usage) and a ragged larger batch.
    for n, kx in ((8, k_x1), (300, k_x2)):
        x = jax.random.normal(kx, (n, Param.gate_feat_in_num), jnp.float32)
        out = jax.block_until_ready(gate_embedding(x, packed))
        ref = gate_embedding_ref(x, w1, b1, w2, b2)
        assert out.shape == (n, Param.room_emb_size)
        assert jnp.allclose(out.astype(jnp.float32), ref,
                            atol=1e-2, rtol=1e-2), f"mismatch N={n}"

    print("KERNEL_OK")
</pallas_src>

<mosaic_0001>
module attributes {stable_mosaic.version = 11 : i64} {
  func.func @gate_embedding_kernel(%arg0: i32, %arg1: memref<8x128xf32, #tpu.memory_space<vmem>>, %arg2: memref<128x256xbf16, #tpu.memory_space<vmem>>, %arg3: memref<1x256xf32, #tpu.memory_space<vmem>>, %arg4: memref<256x256xbf16, #tpu.memory_space<vmem>>, %arg5: memref<1x256xf32, #tpu.memory_space<vmem>>, %arg6: memref<8x256xbf16, #tpu.memory_space<vmem>>) attributes {dimension_semantics = [#tpu.dimension_semantics<parallel>], iteration_bounds = array<i64: 1>, scalar_prefetch = 0 : i64, scratch_operands = 0 : i64, tpu.core_type = #tpu.core_type<tc>, window_params = [{transform_indices = @transform_0, window_bounds = array<i64: 8, 128>}, {pipeline_mode = #tpu.pipeline_mode<synchronous>, transform_indices = @transform_1, window_bounds = array<i64: 128, 256>}, {pipeline_mode = #tpu.pipeline_mode<synchronous>, transform_indices = @transform_2, window_bounds = array<i64: 1, 256>}, {pipeline_mode = #tpu.pipeline_mode<synchronous>, transform_indices = @transform_3, window_bounds = array<i64: 256, 256>}, {pipeline_mode = #tpu.pipeline_mode<synchronous>, transform_indices = @transform_4, window_bounds = array<i64: 1, 256>}, {transform_indices = @transform_5, window_bounds = array<i64: 8, 256>}]} {
    %c0 = arith.constant 0 : index
    %c0_0 = arith.constant 0 : index
    %0 = vector.load %arg1[%c0, %c0_0] : memref<8x128xf32, #tpu.memory_space<vmem>>, vector<8x128xf32>
    %1 = arith.truncf %0 : vector<8x128xf32> to vector<8x128xbf16>
    %c0_1 = arith.constant 0 : index
    %c0_2 = arith.constant 0 : index
    %2 = vector.load %arg2[%c0_1, %c0_2] : memref<128x256xbf16, #tpu.memory_space<vmem>>, vector<128x256xbf16>
    %cst = arith.constant dense<0.000000e+00> : vector<8x256xf32>
    %3 = tpu.matmul %1, %2, %cst {dimension_numbers = #tpu.dot_dimension_numbers<[1], [0], [0], [1], [0, 0, 1, 1], [], []>} : vector<8x128xbf16>, vector<128x256xbf16>, vector<8x256xf32> -> vector<8x256xf32>
    %c0_3 = arith.constant 0 : index
    %c0_4 = arith.constant 0 : index
    %4 = vector.load %arg3[%c0_3, %c0_4] : memref<1x256xf32, #tpu.memory_space<vmem>>, vector<1x256xf32>
    %5 = vector.broadcast %4 : vector<1x256xf32> to vector<8x256xf32>
    %6 = arith.addf %3, %5 : vector<8x256xf32>
    %cst_5 = arith.constant 0.000000e+00 : f32
    %7 = vector.broadcast %cst_5 : f32 to vector<8x256xf32>
    %8 = arith.maximumf %6, %7 : vector<8x256xf32>
    %9 = arith.truncf %8 : vector<8x256xf32> to vector<8x256xbf16>
    %c0_6 = arith.constant 0 : index
    %c0_7 = arith.constant 0 : index
    %10 = vector.load %arg4[%c0_6, %c0_7] : memref<256x256xbf16, #tpu.memory_space<vmem>>, vector<256x256xbf16>
    %cst_8 = arith.constant dense<0.000000e+00> : vector<8x256xf32>
    %11 = tpu.matmul %9, %10, %cst_8 {dimension_numbers = #tpu.dot_dimension_numbers<[1], [0], [0], [1], [0, 0, 1, 1], [], []>} : vector<8x256xbf16>, vector<256x256xbf16>, vector<8x256xf32> -> vector<8x256xf32>
    %c0_9 = arith.constant 0 : index
    %c0_10 = arith.constant 0 : index
    %12 = vector.load %arg5[%c0_9, %c0_10] : memref<1x256xf32, #tpu.memory_space<vmem>>, vector<1x256xf32>
    %13 = vector.broadcast %12 : vector<1x256xf32> to vector<8x256xf32>
    %14 = arith.addf %11, %13 : vector<8x256xf32>
    %15 = arith.truncf %14 : vector<8x256xf32> to vector<8x256xbf16>
    %c0_11 = arith.constant 0 : index
    %c0_12 = arith.constant 0 : index
    %16 = vector.load %arg6[%c0_11, %c0_12] : memref<8x256xbf16, #tpu.memory_space<vmem>>, vector<8x256xbf16>
    tpu.vector_store %arg6[%c0_11, %c0_12], %15 {strides = array<i32>} : memref<8x256xbf16, #tpu.memory_space<vmem>>, vector<8x256xbf16>,
    return
  }
  func.func @transform_0(%arg0: i32) -> (i32, i32) {
    %c0_i32 = arith.constant 0 : i32
    %c0_i32_0 = arith.constant 0 : i32
    return %arg0, %c0_i32 : i32, i32
  }
  func.func @transform_1(%arg0: i32) -> (i32, i32) {
    %c0_i32 = arith.constant 0 : i32
    %c0_i32_0 = arith.constant 0 : i32
    %c0_i32_1 = arith.constant 0 : i32
    return %c0_i32, %c0_i32_0 : i32, i32
  }
  func.func @transform_2(%arg0: i32) -> (i32, i32) {
    %c0_i32 = arith.constant 0 : i32
    %c0_i32_0 = arith.constant 0 : i32
    %c0_i32_1 = arith.constant 0 : i32
    return %c0_i32, %c0_i32_0 : i32, i32
  }
  func.func @transform_3(%arg0: i32) -> (i32, i32) {
    %c0_i32 = arith.constant 0 : i32
    %c0_i32_0 = arith.constant 0 : i32
    %c0_i32_1 = arith.constant 0 : i32
    return %c0_i32, %c0_i32_0 : i32, i32
  }
  func.func @transform_4(%arg0: i32) -> (i32, i32) {
    %c0_i32 = arith.constant 0 : i32
    %c0_i32_0 = arith.constant 0 : i32
    %c0_i32_1 = arith.constant 0 : i32
    return %c0_i32, %c0_i32_0 : i32, i32
  }
  func.func @transform_5(%arg0: i32) -> (i32, i32) {
    %c0_i32 = arith.constant 0 : i32
    %c0_i32_0 = arith.constant 0 : i32
    return %arg0, %c0_i32 : i32, i32
  }
}

</mosaic_0001>

<bundles_post_ra>
// kernel: tpu_custom_call.1
= control target key start
LH: loop header
LB: loop body
LE: loop exit
PB: predicated region body
PF: predicated region fallthrough
CT: control target
= control target key end

     0   :  { %10 = vsyncpa [#allocation3], 0  ;;  %s806_s0 = inlined_call_operand.hbm [shape: f32[8,128], index: 0, kind: input, shape index: {}]   ;;  %s807_s1 = inlined_call_operand.hbm [shape: bf16[128,256], index: 1, kind: input, shape index: {}]   ;;  %s808_s2 = inlined_call_operand.vmem [shape: f32[1,256], index: 2, kind: input, shape index: {}]   ;;  %s809_s3 = inlined_call_operand.hbm [shape: bf16[256,256], index: 3, kind: input, shape index: {}]   ;;  %s810_s4 = inlined_call_operand.vmem [shape: f32[1,256], index: 4, kind: input, shape index: {}]   ;;  %s811_s5 = inlined_call_operand.hbm [shape: bf16[8,256], index: 5, kind: output, shape index: {}]  }
   0x1   :  { %11 = vsyncpa [#allocation6], 0 }
   0x2   :  { %12 = vsyncpa [#allocation4], 0  ;;  %s709_s18 = smov [#allocation5]   ;;  %s615_s22 = scalar_lea.hbm %s807_s1, 2048 }
   0x3   :  { %s28_s19 = sshll.u32 %s709_s18, 4  ;;  %p616_p0 = scmp.ne.s32.totalorder %s807_s1, %s615_s22  ;;  %s29_s19 = int_to_ptr.vmem [resolvable:$true] %s28_s19 }
   0x4   :  { %p619_p1 = scmp.lt.u32.totalorder %s615_s22, %s807_s1 }
   0x6   :  { %p621_p2 = pnand %p619_p1, %p616_p0 }
   0x8   :  { %624 = shalt.err (!%p621_p2)
}
   0x9   :  { %s625_s27 = scalar_lea.vmem %s29_s19, 2048  ;;  %p630_p4 = scmp.lt.s32.totalorder %s29_s19, %s29_s19 }
   0xa   :  { %p626_p3 = scmp.ne.s32.totalorder %s29_s19, %s625_s27  ;;  %p631_p5 = scmp.lt.s32.totalorder %s625_s27, %s625_s27 }
   0xc   :  { %p632_p6 = por %p631_p5, %p630_p4 }
   0xe   :  { %p633_p7 = pnand %p632_p6, %p626_p3 }
  0x10   :  { %636 = shalt.err (!%p633_p7)
}
  0x11   :  { %s710_s28 = smov 128   ;;  %s711_s29 = smov 8  }
  0x12   :  { %34 = dma.hbm_to_vmem [thread:$0]  %s807_s1, 2048, %s29_s19, [#allocation6], %s710_s28, %s710_s28, %s711_s29  }
  0x13   :  { %s712_s7 = smov [#allocation2]   ;;  %s713_s9 = smov [#allocation7]  }
  0x14   :  { %s19_s8 = sshll.u32 %s712_s7, 4  ;;  %s42_s10 = sshll.u32 %s713_s9, 4  ;;  %s20_s8 = int_to_ptr.vmem [resolvable:$true] %s19_s8  ;;  %s43_s10 = int_to_ptr.vmem [resolvable:$true] %s42_s10 }
  0x15   :  { %s637_s13 = scalar_lea.hbm %s806_s0, 128 }
  0x16   :  { %p638_p8 = scmp.ne.s32.totalorder %s806_s0, %s637_s13  ;;  %p641_p9 = scmp.lt.u32.totalorder %s637_s13, %s806_s0 }
  0x18   :  { %p643_p10 = pnand %p641_p9, %p638_p8 }
  0x1a   :  { %646 = shalt.err (!%p643_p10)
}
  0x1b   :  { %s647_s1 = scalar_lea.vmem %s20_s8, 128  ;;  %p652_p12 = scmp.lt.s32.totalorder %s20_s8, %s20_s8 }
  0x1c   :  { %p648_p11 = scmp.ne.s32.totalorder %s20_s8, %s647_s1  ;;  %p653_p13 = scmp.lt.s32.totalorder %s647_s1, %s647_s1 }
  0x1e   :  { %p654_p0 = por %p653_p13, %p652_p12 }
  0x20   :  { %p655_p1 = pnand %p654_p0, %p648_p11 }
  0x22   :  { %658 = shalt.err (!%p655_p1)
}
  0x23   :  { %22 = dma.hbm_to_vmem [thread:$0]  %s806_s0, 128, %s20_s8, [#allocation3]  }
  0x24   :  { %s659_s22 = scalar_lea.hbm %s809_s3, 4096 }
  0x25   :  { %p660_p2 = scmp.ne.s32.totalorder %s809_s3, %s659_s22  ;;  %p663_p3 = scmp.lt.u32.totalorder %s659_s22, %s809_s3 }
  0x27   :  { %p665_p4 = pnand %p663_p3, %p660_p2 }
  0x29   :  { %668 = shalt.err (!%p665_p4)
}
  0x2a   :  { %s669_s27 = scalar_lea.vmem %s43_s10, 4096  ;;  %p674_p6 = scmp.lt.s32.totalorder %s43_s10, %s43_s10 }
  0x2b   :  { %p670_p5 = scmp.ne.s32.totalorder %s43_s10, %s669_s27  ;;  %p675_p7 = scmp.lt.s32.totalorder %s669_s27, %s669_s27 }
  0x2d   :  { %p676_p8 = por %p675_p7, %p674_p6 }
  0x2f   :  { %p677_p9 = pnand %p676_p8, %p670_p5 }
  0x31   :  { %680 = shalt.err (!%p677_p9)
}
  0x32   :  { %48 = dma.hbm_to_vmem [thread:$0]  %s809_s3, 4096, %s43_s10, [#allocation6], %s710_s28, %s710_s28, %s711_s29  }
  0x33   :  { %703 = dma.done.wait [#allocation3], 128  }
  0x34   :  { %704 = vsyncadd [#allocation3], 4294967168 }
  0x35   :  { %705 = dma.done.wait [#allocation6], 6144  }
  0x36   :  { %706 = vsyncadd [#allocation6], 4294961152  ;;  %v714_v0 = vmov 0   ;;  %v543_v1 = vld [vmem:[#allocation5 + $0x4] ss:$8 sps:$4 sm:$0xff]   ;;  %v61_v26 = vld [vmem:[#allocation2] sm:$0xff]  ;;  %v81_v51 = vlaneseq }
  0x37   :  { %203 = vmatprep.mubr.bf16.mxu0 %v714_v0  ;;  %v545_v2 = vld [vmem:[#allocation5] ss:$8 sps:$4 sm:$0xff]   ;;  %171 = vmatprep.subr.bf16.mxu0 %v543_v1  ;;  %v546_v3 = vld [vmem:[#allocation5 + $0x14] ss:$8 sps:$4 sm:$0xff]   ;;  %v548_v4 = vld [vmem:[#allocation5 + $0x10] ss:$8 sps:$4 sm:$0xff]   ;;  %v62_v30 = vpack.c.bf16 %v61_v26, %v61_v26 }
  0x38   :  { %172 = vmatpush1.bf16.msra.mxu0 %v545_v2  ;;  %v549_v5 = vld [vmem:[#allocation5 + $0x24] ss:$8 sps:$4 sm:$0xff]   ;;  %v551_v6 = vld [vmem:[#allocation5 + $0x20] ss:$8 sps:$4 sm:$0xff]   ;;  %v552_v7 = vld [vmem:[#allocation5 + $0x34] ss:$8 sps:$4 sm:$0xff]  }
  0x39   :  { %173 = vmatprep.subr.bf16.mxu0 %v546_v3  ;;  %v554_v8 = vld [vmem:[#allocation5 + $0x30] ss:$8 sps:$4 sm:$0xff]   ;;  %v555_v9 = vld [vmem:[#allocation5 + $0x44] ss:$8 sps:$4 sm:$0xff]   ;;  %v569_v11 = vld [vmem:[#allocation7] ss:$8 sps:$4 sm:$0xff]  }
  0x3a   :  { %v567_v10 = vld [vmem:[#allocation7 + $0x4] ss:$8 sps:$4 sm:$0xff]   ;;  %v570_v12 = vld [vmem:[#allocation7 + $0x14] ss:$8 sps:$4 sm:$0xff]   ;;  %v557_v13 = vld [vmem:[#allocation5 + $0x40] ss:$8 sps:$4 sm:$0xff]  }
  0x3b   :  { %420 = vmatprep.subr.bf16.mxu1 %v567_v10  ;;  %v572_v14 = vld [vmem:[#allocation7 + $0x10] ss:$8 sps:$4 sm:$0xff]   ;;  %v573_v15 = vld [vmem:[#allocation7 + $0x24] ss:$8 sps:$4 sm:$0xff]   ;;  %v558_v16 = vld [vmem:[#allocation5 + $0x54] ss:$8 sps:$4 sm:$0xff]  }
  0x3c   :  { %174 = vmatpush1.bf16.msra.mxu0 %v548_v4  ;;  %421 = vmatpush1.bf16.msra.mxu1 %v569_v11  ;;  %v560_v17 = vld [vmem:[#allocation5 + $0x50] ss:$8 sps:$4 sm:$0xff]   ;;  %v575_v18 = vld [vmem:[#allocation7 + $0x20] ss:$8 sps:$4 sm:$0xff]   ;;  %v576_v19 = vld [vmem:[#allocation7 + $0x34] ss:$8 sps:$4 sm:$0xff]  }
  0x3d   :  { %175 = vmatprep.subr.bf16.mxu0 %v549_v5  ;;  %422 = vmatprep.subr.bf16.mxu1 %v570_v12  ;;  %v561_v20 = vld [vmem:[#allocation5 + $0x64] ss:$8 sps:$4 sm:$0xff]   ;;  %v563_v21 = vld [vmem:[#allocation5 + $0x60] ss:$8 sps:$4 sm:$0xff]   ;;  %v578_v22 = vld [vmem:[#allocation7 + $0x30] ss:$8 sps:$4 sm:$0xff]  }
  0x3e   :  { %v579_v23 = vld [vmem:[#allocation7 + $0x44] ss:$8 sps:$4 sm:$0xff]   ;;  %v564_v24 = vld [vmem:[#allocation5 + $0x74] ss:$8 sps:$4 sm:$0xff]   ;;  %v566_v25 = vld [vmem:[#allocation5 + $0x70] ss:$8 sps:$4 sm:$0xff]  }
  0x3f   :  { %v581_v27 = vld [vmem:[#allocation7 + $0x40] ss:$8 sps:$4 sm:$0xff]   ;;  %v582_v28 = vld [vmem:[#allocation7 + $0x54] ss:$8 sps:$4 sm:$0xff]   ;;  %v584_v29 = vld [vmem:[#allocation7 + $0x50] ss:$8 sps:$4 sm:$0xff]  }
  0x40   :  { %176 = vmatpush1.bf16.msra.mxu0 %v551_v6  ;;  %423 = vmatpush1.bf16.msra.mxu1 %v572_v14  ;;  %v585_v31 = vld [vmem:[#allocation7 + $0x64] ss:$8 sps:$4 sm:$0xff]   ;;  %v587_v32 = vld [vmem:[#allocation7 + $0x60] ss:$8 sps:$4 sm:$0xff]   ;;  %v588_v33 = vld [vmem:[#allocation7 + $0x74] ss:$8 sps:$4 sm:$0xff]  }
  0x41   :  { %177 = vmatprep.subr.bf16.mxu0 %v552_v7  ;;  %424 = vmatprep.subr.bf16.mxu1 %v573_v15  ;;  %v590_v34 = vld [vmem:[#allocation7 + $0x70] ss:$8 sps:$4 sm:$0xff]   ;;  %v591_v35 = vld [vmem:[#allocation7 + $0x84] ss:$8 sps:$4 sm:$0xff]   ;;  %v593_v36 = vld [vmem:[#allocation7 + $0x80] ss:$8 sps:$4 sm:$0xff]  }
  0x42   :  { %v594_v37 = vld [vmem:[#allocation7 + $0x94] ss:$8 sps:$4 sm:$0xff]   ;;  %v596_v38 = vld [vmem:[#allocation7 + $0x90] ss:$8 sps:$4 sm:$0xff]   ;;  %v597_v39 = vld [vmem:[#allocation7 + $0xa4] ss:$8 sps:$4 sm:$0xff]  }
  0x43   :  { %v599_v40 = vld [vmem:[#allocation7 + $0xa0] ss:$8 sps:$4 sm:$0xff]   ;;  %v600_v41 = vld [vmem:[#allocation7 + $0xb4] ss:$8 sps:$4 sm:$0xff]   ;;  %v602_v42 = vld [vmem:[#allocation7 + $0xb0] ss:$8 sps:$4 sm:$0xff]  }
  0x44   :  { %178 = vmatpush1.bf16.msra.mxu0 %v554_v8  ;;  %425 = vmatpush1.bf16.msra.mxu1 %v575_v18  ;;  %v603_v43 = vld [vmem:[#allocation7 + $0xc4] ss:$8 sps:$4 sm:$0xff]   ;;  %v605_v44 = vld [vmem:[#allocation7 + $0xc0] ss:$8 sps:$4 sm:$0xff]   ;;  %v606_v45 = vld [vmem:[#allocation7 + $0xd4] ss:$8 sps:$4 sm:$0xff]  }
  0x45   :  { %179 = vmatprep.subr.bf16.mxu0 %v555_v9  ;;  %426 = vmatprep.subr.bf16.mxu1 %v576_v19  ;;  %v608_v46 = vld [vmem:[#allocation7 + $0xd0] ss:$8 sps:$4 sm:$0xff]   ;;  %v609_v47 = vld [vmem:[#allocation7 + $0xe4] ss:$8 sps:$4 sm:$0xff]   ;;  %v611_v48 = vld [vmem:[#allocation7 + $0xe0] ss:$8 sps:$4 sm:$0xff]  }
  0x46   :  { %v612_v49 = vld [vmem:[#allocation7 + $0xf4] ss:$8 sps:$4 sm:$0xff]   ;;  %v614_v50 = vld [vmem:[#allocation7 + $0xf0] ss:$8 sps:$4 sm:$0xff]   ;;  %v82_v52 = vshrl.u32 %v81_v51, 7 }
  0x47   :  { %v79_v54 = vld [vmem:[%s808_s2] sm:$0x3]  ;;  %s715_s2 = smov [#allocation8]  }
  0x48   :  { %180 = vmatpush1.bf16.msra.mxu0 %v557_v13  ;;  %427 = vmatpush1.bf16.msra.mxu1 %v578_v22  ;;  %v83_v53 = vsub.s32 0, %v82_v52  ;;  %v87_v55 = vsub.s32 1, %v82_v52  ;;  %v248_v4 = vld [vmem:[%s810_s4] sm:$0x3]  ;;  %s476_s7 = sshll.u32 %s715_s2, 4  ;;  %s477_s7 = int_to_ptr.vmem [resolvable:$true] %s476_s7 }
  0x49   :  { %181 = vmatprep.subr.bf16.mxu0 %v558_v16  ;;  %428 = vmatprep.subr.bf16.mxu1 %v579_v23  ;;  %s681_s8 = scalar_lea.vmem %s477_s7, 128  ;;  %p686_p11 = scmp.lt.s32.totalorder %s477_s7, %s477_s7 }
  0x4a   :  { %v84_v56 = vrot.slane %v79_v54, %v83_v53  ;;  %v88_v57 = vrot.slane %v79_v54, %v87_v55  ;;  %v253_v5 = vrot.slane %v248_v4, %v83_v53  ;;  %v257_v6 = vrot.slane %v248_v4, %v87_v55  ;;  %p682_p10 = scmp.ne.s32.totalorder %s477_s7, %s681_s8  ;;  %p687_p12 = scmp.lt.s32.totalorder %s681_s8, %s681_s8 }
  0x4c   :  { %182 = vmatpush1.bf16.msra.mxu0 %v560_v17  ;;  %429 = vmatpush1.bf16.msra.mxu1 %v581_v27  ;;  %p688_p13 = por %p687_p12, %p686_p11 }
  0x4d   :  { %183 = vmatprep.subr.bf16.mxu0 %v561_v20  ;;  %430 = vmatprep.subr.bf16.mxu1 %v582_v28 }
  0x4e   :  { %p689_p0 = pnand %p688_p13, %p682_p10 }
  0x50   :  { %184 = vmatpush1.bf16.msra.mxu0 %v563_v21  ;;  %431 = vmatpush1.bf16.msra.mxu1 %v584_v29 }
  0x51   :  { %185 = vmatprep.subr.bf16.mxu0 %v564_v24  ;;  %432 = vmatprep.subr.bf16.mxu1 %v585_v31 }
  0x54   :  { %186 = vmatpush1.bf16.msra.mxu0 %v566_v25  ;;  %433 = vmatpush1.bf16.msra.mxu1 %v587_v32 }
  0x55   :  { %434 = vmatprep.subr.bf16.mxu1 %v588_v33 }
  0x57   :  { %204 = vmatmul.mubr.bf16.vlgmr.msra.gmra.mrb[0].mxu0 %v62_v30 }
  0x58   :  { %435 = vmatpush1.bf16.msra.mxu1 %v590_v34 }
  0x59   :  { %436 = vmatprep.subr.bf16.mxu1 %v591_v35 }
  0x5c   :  { %437 = vmatpush1.bf16.msra.mxu1 %v593_v36 }
  0x5d   :  { %438 = vmatprep.subr.bf16.mxu1 %v594_v37 }
  0x60   :  { %439 = vmatpush1.bf16.msra.mxu1 %v596_v38 }
  0x61   :  { %440 = vmatprep.subr.bf16.mxu1 %v597_v39 }
  0x64   :  { %441 = vmatpush1.bf16.msra.mxu1 %v599_v40 }
  0x65   :  { %442 = vmatprep.subr.bf16.mxu1 %v600_v41 }
  0x68   :  { %443 = vmatpush1.bf16.msra.mxu1 %v602_v42 }
  0x69   :  { %444 = vmatprep.subr.bf16.mxu1 %v603_v43 }
  0x6c   :  { %445 = vmatpush1.bf16.msra.mxu1 %v605_v44 }
  0x6d   :  { %446 = vmatprep.subr.bf16.mxu1 %v606_v45 }
  0x70   :  { %447 = vmatpush1.bf16.msra.mxu1 %v608_v46 }
  0x71   :  { %448 = vmatprep.subr.bf16.mxu1 %v609_v47 }
  0x74   :  { %449 = vmatpush1.bf16.msra.mxu1 %v611_v48 }
  0x75   :  { %450 = vmatprep.subr.bf16.mxu1 %v612_v49 }
  0x78   :  { %451 = vmatpush1.bf16.msra.mxu1 %v614_v50 }
 0x12a   :  { %v205_v58 = vpop.f32.mrb[0].mxu0 }
 0x12b   :  { %v206_v59 = vadd.f32 %v205_v58, %v84_v56  ;;  %v207_v60 = vpop.f32.mrb[1].mxu0 }
 0x12c   :  { %v208_v61 = vadd.f32 %v207_v60, %v88_v57  ;;  %v209_v62 = vpop.f32.mrb[2].mxu0 }
 0x12d   :  { %v212_v63 = vmax.f32 %v206_v59, 0.0  ;;  %v210_v0 = vpop.f32.mrb[3].mxu0 }
 0x12e   :  { %v213_v1 = vmax.f32 %v208_v61, 0.0 }
 0x12f   :  { %v214_v3 = vpack.c.bf16 %v212_v63, %v212_v63 }
 0x130   :  { %v215_v2 = vpack.c.bf16 %v213_v1, %v213_v1 }
 0x132   :  { %452 = vmatprep.mubr.bf16.mxu1 %v215_v2 }
 0x133   :  { %453 = vmatmul.mubr.bf16.vlgmr.msra.gmra.mrb[0].mxu1 %v214_v3 }
 0x206   :  { %v454_v7 = vpop.f32.mrb[0].mxu1 }
 0x207   :  { %v455_v8 = vadd.f32 %v454_v7, %v253_v5  ;;  %v456_v9 = vpop.f32.mrb[1].mxu1 }
 0x208   :  { %v457_v10 = vadd.f32 %v456_v9, %v257_v6  ;;  %v458_v11 = vpop.f32.mrb[2].mxu1 }
 0x209   :  { %v459_v12 = vpop.f32.mrb[3].mxu1 }
 0x20a   :  { %v535_v13 = vpack.c.bf16 %v457_v10, %v455_v8 }
 0x20c   :  { %469 = vst [vmem:[#allocation8] sm:$0xff] %v535_v13 }
 0x20d   :  { %692 = shalt.err (!%p689_p0)
}
 0x20e   :  { %s693_s10 = scalar_lea.hbm %s811_s5, 128 }
 0x20f   :  { %p694_p1 = scmp.ne.s32.totalorder %s811_s5, %s693_s10  ;;  %p697_p2 = scmp.lt.u32.totalorder %s693_s10, %s811_s5 }
 0x211   :  { %p699_p3 = pnand %p697_p2, %p694_p1 }
 0x213   :  { %702 = shalt.err (!%p699_p3)
}
 0x214   :  { %479 = dma.vmem_to_hbm [thread:$0]  %s477_s7, 128, %s811_s5, [#allocation4]  }
 0x215   :  { %707 = dma.done.wait [#allocation4], 128  }
 0x216   :  { %708 = vsyncadd [#allocation4], 4294967168 }
 0x217   :  { %483 = vsyncpa [#allocation3], 1 }
 0x218   :  { %484 = vsyncpa [#allocation6], 1 }
 0x219   :  { %485 = vsyncpa [#allocation4], 1 }

</bundles_post_ra>
